<compile_context>
chip_gen: v6e
topology: v6e:2x2x1
jax: 0.10.0
libtpu: 0.0.40
codegen_flags: <defaults>
</compile_context>

<pallas_src>
import functools

import jax
import jax.numpy as jnp
from jax.experimental import pallas as pl
from jax.experimental.pallas import tpu as pltpu

_LANE = 128            # boxes per lane row
_MAX_TM = 512          # max sublane rows per grid step -> 65536 boxes / step
_MIN_PALLAS_ROWS = 8   # below this (N < 1024) use the plain-XLA fallback
_EPS = 1e-7

# Stacked slab channel layout: pred params 0..6, target params 7..13, weight 14.
_N_CH = 15


def _per_box_weighted_loss(box_ref):
    """box_ref: (15, TM, 128) slab -> weighted (1 - IoU3D), shape (TM, 128)."""
    f32 = jnp.float32
    px = box_ref[0].astype(f32)
    py = box_ref[1].astype(f32)
    pz = box_ref[2].astype(f32)
    # Half-extents computed once; dims clamped to >= 0 so volumes / union can
    # never go negative for degenerate predictions.
    hpx = 0.5 * jnp.maximum(box_ref[3].astype(f32), 0.0)
    hpy = 0.5 * jnp.maximum(box_ref[4].astype(f32), 0.0)
    hpz = 0.5 * jnp.maximum(box_ref[5].astype(f32), 0.0)
    tx = box_ref[7].astype(f32)
    ty = box_ref[8].astype(f32)
    tz = box_ref[9].astype(f32)
    htx = 0.5 * jnp.maximum(box_ref[10].astype(f32), 0.0)
    hty = 0.5 * jnp.maximum(box_ref[11].astype(f32), 0.0)
    htz = 0.5 * jnp.maximum(box_ref[12].astype(f32), 0.0)
    w = box_ref[14].astype(f32)

    def overlap(pc, ph, tc, th):
        lo = jnp.maximum(pc - ph, tc - th)
        hi = jnp.minimum(pc + ph, tc + th)
        return jnp.maximum(hi - lo, 0.0)

    inter = (overlap(px, hpx, tx, htx)
             * overlap(py, hpy, ty, hty)
             * overlap(pz, hpz, tz, htz))
    vol_p = 8.0 * (hpx * hpy * hpz)
    vol_t = 8.0 * (htx * hty * htz)
    union = jnp.maximum(vol_p + vol_t - inter, _EPS)

    # Reciprocal on the EUP (its own VLIW slot) instead of a VALU divide.
    iou = inter * pl.reciprocal(union, approx=True)
    return (1.0 - iou) * w


def _iou3d_loss_kernel(box_ref, loss_ref):
    """Per-box weighted loss; used for reduction='none'."""
    loss_ref[...] = _per_box_weighted_loss(box_ref).astype(loss_ref.dtype)


def _iou3d_psum_kernel(box_ref, psum_ref):
    """Per-tile (8, 128) partial sum of the weighted loss; used for sum/mean."""
    loss = _per_box_weighted_loss(box_ref)                       # (TM, 128)
    tm = loss.shape[0]
    # (TM, 128) f32 is stored as TM/8 native (8, 128) vreg tiles, so this
    # reshape is layout-preserving and the axis-0 sum is pure VALU adds.
    partial = loss.reshape(tm // 8, 8, _LANE).sum(axis=0)        # (8, 128)
    psum_ref[...] = partial[None].astype(psum_ref.dtype)


@functools.partial(jax.jit, static_argnums=(1,))
def _iou3d_pallas_none(slab, tm):
    """slab: (15, M, 128) -> per-box weighted loss, shape (M, 128)."""
    m_pad = slab.shape[1]
    grid = (m_pad // tm,)
    return pl.pallas_call(
        _iou3d_loss_kernel,
        out_shape=jax.ShapeDtypeStruct((m_pad, _LANE), jnp.float32),
        grid_spec=pltpu.PrefetchScalarGridSpec(
            num_scalar_prefetch=0,
            grid=grid,
            in_specs=[pl.BlockSpec((_N_CH, tm, _LANE), lambda i: (0, i, 0))],
            out_specs=pl.BlockSpec((tm, _LANE), lambda i: (i, 0)),
        ),
        # Tiles are fully independent -> megacore sharding on v7x; harmless on
        # single-TC v5e/v6e.
        compiler_params=pltpu.CompilerParams(
            dimension_semantics=("parallel",)),
    )(slab)


@functools.partial(jax.jit, static_argnums=(1,))
def _iou3d_pallas_sum(slab, tm):
    """slab: (15, M, 128) -> scalar sum of the per-box weighted loss."""
    m_pad = slab.shape[1]
    n_tiles = m_pad // tm
    psums = pl.pallas_call(
        _iou3d_psum_kernel,
        out_shape=jax.ShapeDtypeStruct((n_tiles, 8, _LANE), jnp.float32),
        grid_spec=pltpu.PrefetchScalarGridSpec(
            num_scalar_prefetch=0,
            grid=(n_tiles,),
            in_specs=[pl.BlockSpec((_N_CH, tm, _LANE), lambda i: (0, i, 0))],
            out_specs=pl.BlockSpec((1, 8, _LANE), lambda i: (i, 0, 0)),
        ),
        compiler_params=pltpu.CompilerParams(
            dimension_semantics=("parallel",)),
    )(slab)
    return jnp.sum(psums)


def _choose_tiling(m):
    """Pick (tm, m_pad) with tm % 8 == 0 and >= 2 grid steps (v7x megacore)."""
    if m <= 2 * _MAX_TM:
        m_pad = -(-m // 16) * 16      # multiple of 16 -> tm = m_pad/2 is % 8
        tm = m_pad // 2               # exactly 2 parallel grid steps
    else:
        tm = _MAX_TM
        m_pad = -(-m // tm) * tm      # >= 3 grid steps
    return tm, m_pad


def _prepare_slab(pred, target, weight):
    """Build the single parameter-major (15, M, 128) input slab.

    pred/target: (N, 7), weight: (N,).  Padding weights are zero, so padded
    boxes contribute zero loss.  The pad + concat + transpose is one fused XLA
    copy (one DMA stream into the kernel instead of three).
    """
    n = pred.shape[0]
    m = max(1, -(-n // _LANE))
    tm, m_pad = _choose_tiling(m)
    n_pad = m_pad * _LANE
    pad = n_pad - n

    pred_p = jnp.pad(pred, ((0, pad), (0, 0)))
    tgt_p = jnp.pad(target, ((0, pad), (0, 0)))
    w_p = jnp.pad(weight, ((0, pad),))[:, None]
    stacked = jnp.concatenate([pred_p, tgt_p, w_p], axis=1)      # (n_pad, 15)
    slab = stacked.T.reshape(_N_CH, m_pad, _LANE)                # (15, M, 128)
    return slab, tm, n_pad


def _per_box_loss_xla(pred, target):
    """Pure-XLA per-box (1 - IoU3D); fallback for tiny N and reference check."""
    pc, pd = pred[:, :3], jnp.maximum(pred[:, 3:6], 0.0)
    tc, td = target[:, :3], jnp.maximum(target[:, 3:6], 0.0)
    lo = jnp.maximum(pc - 0.5 * pd, tc - 0.5 * td)
    hi = jnp.minimum(pc + 0.5 * pd, tc + 0.5 * td)
    inter = jnp.prod(jnp.maximum(hi - lo, 0.0), axis=-1)
    vol_p = jnp.prod(pd, axis=-1)
    vol_t = jnp.prod(td, axis=-1)
    union = jnp.maximum(vol_p + vol_t - inter, _EPS)
    return 1.0 - inter / union


def iou3d_loss(pred, target, weight=None, reduction='mean', avg_factor=None):
    """1 - IoU3D loss. pred/target: (N, 7) float32, weight: (N,) or None."""
    pred = jnp.asarray(pred, jnp.float32)
    target = jnp.asarray(target, jnp.float32)
    n = pred.shape[0]
    if weight is None:
        weight = jnp.ones((n,), jnp.float32)
    else:
        weight = jnp.asarray(weight, jnp.float32)

    m = max(1, -(-n // _LANE))
    if m < _MIN_PALLAS_ROWS:
        # Tiny N: pallas_call launch + layout prep would dominate.
        per_box = _per_box_loss_xla(pred, target) * weight
        if reduction == 'none':
            return per_box
        total = jnp.sum(per_box)
    else:
        slab, tm, n_pad = _prepare_slab(pred, target, weight)
        if reduction == 'none':
            per_elem = _iou3d_pallas_none(slab, tm)              # (M, 128)
            return per_elem.reshape(n_pad)[:n]
        # Common training path: in-kernel partial sums, no full-size writeback.
        total = _iou3d_pallas_sum(slab, tm)

    if reduction == 'sum':
        return total
    # reduction == 'mean'  (mmdet weight_reduce_loss semantics)
    if avg_factor is None:
        return total / n
    return total / avg_factor


class IoU3DMixin:
    """Adapted from GIoULoss (mmdet3d IoU3DMixin) — JAX/Pallas version."""

    def __init__(self, loss_function, reduction='mean', loss_weight=1.0):
        self.loss_function = loss_function
        self.reduction = reduction
        self.loss_weight = loss_weight

    def __call__(self, pred, target, weight=None, avg_factor=None,
                 reduction_override=None, **kwargs):
        assert reduction_override in (None, 'none', 'mean', 'sum')
        reduction = reduction_override if reduction_override else self.reduction
        if weight is not None:
            weight = jnp.asarray(weight, jnp.float32)
            if reduction == 'none':
                # Host-synced degenerate all-zero-weight check kept only where
                # the return *shape* depends on it; for 'mean'/'sum' the
                # forward value is 0 either way, so no device->host sync on
                # the common path.
                if not bool(jnp.any(weight > 0)):
                    return (jnp.asarray(pred) * weight).sum()
            if weight.ndim > 1:
                weight = weight.mean(-1)
        loss = self.loss_function(pred, target, weight, reduction=reduction,
                                  avg_factor=avg_factor, **kwargs)
        if self.loss_weight != 1.0:
            loss = self.loss_weight * loss
        return loss


if __name__ == "__main__":
    key = jax.random.PRNGKey(0)
    k1, k2, k3, k4, k5 = jax.random.split(key, 5)

    # 2048 boxes -> 16 lane-rows -> tm=8, grid=(2,): exercises the Pallas path
    # (both the per-box and the partial-sum kernel) with >= 2 parallel steps.
    N = 2048

    centers = jax.random.uniform(k1, (N, 3), jnp.float32, 0.0, 10.0)
    dims = jax.random.uniform(k2, (N, 3), jnp.float32, 0.5, 3.0)
    yaw = jax.random.uniform(k3, (N, 1), jnp.float32, -3.14, 3.14)
    pred = jnp.concatenate([centers, dims, yaw], axis=-1)            # (N, 7)

    noise = 0.2 * jax.random.normal(k4, (N, 7), jnp.float32)
    target = pred + noise                                            # (N, 7)

    # weight with trailing dim > 1 to exercise the weight.mean(-1) path
    weight = jax.random.uniform(k5, (N, 7), jnp.float32, 0.5, 1.5)   # (N, 7)

    loss_module = IoU3DMixin(iou3d_loss, reduction='mean', loss_weight=1.0)

    loss_mean = loss_module(pred, target, weight=weight)
    loss_sum = loss_module(pred, target, weight=weight,
                           reduction_override='sum')
    loss_none = loss_module(pred, target, weight=weight,
                            reduction_override='none')
    jax.block_until_ready((loss_mean, loss_sum, loss_none))

    assert loss_none.shape == (N,)
    assert bool(jnp.isfinite(loss_mean)) and bool(jnp.isfinite(loss_sum))
    # per-box kernel path and in-kernel partial-sum path must agree
    assert jnp.allclose(jnp.sum(loss_none), loss_sum, rtol=1e-4, atol=1e-4)
    assert jnp.allclose(loss_mean, loss_sum / N, rtol=1e-5, atol=1e-6)

    # cross-check vs the pure-XLA reference (loose tol: approx reciprocal)
    ref_none = _per_box_loss_xla(pred, target) * weight.mean(-1)
    assert jnp.allclose(loss_none, ref_none, rtol=1e-2, atol=5e-3)

    # small-N XLA fallback path still works
    small = loss_module(pred[:100], target[:100], weight=weight[:100])
    jax.block_until_ready(small)
    assert bool(jnp.isfinite(small))

    print("KERNEL_OK")
</pallas_src>

<mosaic_0001>
module attributes {stable_mosaic.version = 11 : i64} {
  func.func @_iou3d_psum_kernel(%arg0: i32, %arg1: memref<15x8x128xf32, #tpu.memory_space<vmem>>, %arg2: memref<1x8x128xf32, #tpu.memory_space<vmem>>) attributes {dimension_semantics = [#tpu.dimension_semantics<parallel>], iteration_bounds = array<i64: 2>, scalar_prefetch = 0 : i64, scratch_operands = 0 : i64, tpu.core_type = #tpu.core_type<tc>, window_params = [{transform_indices = @transform_0, window_bounds = array<i64: 15, 8, 128>}, {transform_indices = @transform_1, window_bounds = array<i64: 1, 8, 128>}]} {
    %c0 = arith.constant 0 : index
    %c0_0 = arith.constant 0 : index
    %c0_1 = arith.constant 0 : index
    %0 = vector.load %arg1[%c0, %c0_0, %c0_1] : memref<15x8x128xf32, #tpu.memory_space<vmem>>, vector<1x8x128xf32>
    %1 = vector.shape_cast %0 : vector<1x8x128xf32> to vector<8x128xf32>
    %c1 = arith.constant 1 : index
    %c0_2 = arith.constant 0 : index
    %c0_3 = arith.constant 0 : index
    %2 = vector.load %arg1[%c1, %c0_2, %c0_3] : memref<15x8x128xf32, #tpu.memory_space<vmem>>, vector<1x8x128xf32>
    %3 = vector.shape_cast %2 : vector<1x8x128xf32> to vector<8x128xf32>
    %c2 = arith.constant 2 : index
    %c0_4 = arith.constant 0 : index
    %c0_5 = arith.constant 0 : index
    %4 = vector.load %arg1[%c2, %c0_4, %c0_5] : memref<15x8x128xf32, #tpu.memory_space<vmem>>, vector<1x8x128xf32>
    %5 = vector.shape_cast %4 : vector<1x8x128xf32> to vector<8x128xf32>
    %c3 = arith.constant 3 : index
    %c0_6 = arith.constant 0 : index
    %c0_7 = arith.constant 0 : index
    %6 = vector.load %arg1[%c3, %c0_6, %c0_7] : memref<15x8x128xf32, #tpu.memory_space<vmem>>, vector<1x8x128xf32>
    %7 = vector.shape_cast %6 : vector<1x8x128xf32> to vector<8x128xf32>
    %cst = arith.constant 0.000000e+00 : f32
    %8 = vector.broadcast %cst : f32 to vector<8x128xf32>
    %9 = arith.maximumf %7, %8 : vector<8x128xf32>
    %cst_8 = arith.constant 5.000000e-01 : f32
    %10 = vector.broadcast %cst_8 : f32 to vector<8x128xf32>
    %11 = arith.mulf %10, %9 : vector<8x128xf32>
    %c4 = arith.constant 4 : index
    %c0_9 = arith.constant 0 : index
    %c0_10 = arith.constant 0 : index
    %12 = vector.load %arg1[%c4, %c0_9, %c0_10] : memref<15x8x128xf32, #tpu.memory_space<vmem>>, vector<1x8x128xf32>
    %13 = vector.shape_cast %12 : vector<1x8x128xf32> to vector<8x128xf32>
    %cst_11 = arith.constant 0.000000e+00 : f32
    %14 = vector.broadcast %cst_11 : f32 to vector<8x128xf32>
    %15 = arith.maximumf %13, %14 : vector<8x128xf32>
    %cst_12 = arith.constant 5.000000e-01 : f32
    %16 = vector.broadcast %cst_12 : f32 to vector<8x128xf32>
    %17 = arith.mulf %16, %15 : vector<8x128xf32>
    %c5 = arith.constant 5 : index
    %c0_13 = arith.constant 0 : index
    %c0_14 = arith.constant 0 : index
    %18 = vector.load %arg1[%c5, %c0_13, %c0_14] : memref<15x8x128xf32, #tpu.memory_space<vmem>>, vector<1x8x128xf32>
    %19 = vector.shape_cast %18 : vector<1x8x128xf32> to vector<8x128xf32>
    %cst_15 = arith.constant 0.000000e+00 : f32
    %20 = vector.broadcast %cst_15 : f32 to vector<8x128xf32>
    %21 = arith.maximumf %19, %20 : vector<8x128xf32>
    %cst_16 = arith.constant 5.000000e-01 : f32
    %22 = vector.broadcast %cst_16 : f32 to vector<8x128xf32>
    %23 = arith.mulf %22, %21 : vector<8x128xf32>
    %c7 = arith.constant 7 : index
    %c0_17 = arith.constant 0 : index
    %c0_18 = arith.constant 0 : index
    %24 = vector.load %arg1[%c7, %c0_17, %c0_18] : memref<15x8x128xf32, #tpu.memory_space<vmem>>, vector<1x8x128xf32>
    %25 = vector.shape_cast %24 : vector<1x8x128xf32> to vector<8x128xf32>
    %c8 = arith.constant 8 : index
    %c0_19 = arith.constant 0 : index
    %c0_20 = arith.constant 0 : index
    %26 = vector.load %arg1[%c8, %c0_19, %c0_20] : memref<15x8x128xf32, #tpu.memory_space<vmem>>, vector<1x8x128xf32>
    %27 = vector.shape_cast %26 : vector<1x8x128xf32> to vector<8x128xf32>
    %c9 = arith.constant 9 : index
    %c0_21 = arith.constant 0 : index
    %c0_22 = arith.constant 0 : index
    %28 = vector.load %arg1[%c9, %c0_21, %c0_22] : memref<15x8x128xf32, #tpu.memory_space<vmem>>, vector<1x8x128xf32>
    %29 = vector.shape_cast %28 : vector<1x8x128xf32> to vector<8x128xf32>
    %c10 = arith.constant 10 : index
    %c0_23 = arith.constant 0 : index
    %c0_24 = arith.constant 0 : index
    %30 = vector.load %arg1[%c10, %c0_23, %c0_24] : memref<15x8x128xf32, #tpu.memory_space<vmem>>, vector<1x8x128xf32>
    %31 = vector.shape_cast %30 : vector<1x8x128xf32> to vector<8x128xf32>
    %cst_25 = arith.constant 0.000000e+00 : f32
    %32 = vector.broadcast %cst_25 : f32 to vector<8x128xf32>
    %33 = arith.maximumf %31, %32 : vector<8x128xf32>
    %cst_26 = arith.constant 5.000000e-01 : f32
    %34 = vector.broadcast %cst_26 : f32 to vector<8x128xf32>
    %35 = arith.mulf %34, %33 : vector<8x128xf32>
    %c11 = arith.constant 11 : index
    %c0_27 = arith.constant 0 : index
    %c0_28 = arith.constant 0 : index
    %36 = vector.load %arg1[%c11, %c0_27, %c0_28] : memref<15x8x128xf32, #tpu.memory_space<vmem>>, vector<1x8x128xf32>
    %37 = vector.shape_cast %36 : vector<1x8x128xf32> to vector<8x128xf32>
    %cst_29 = arith.constant 0.000000e+00 : f32
    %38 = vector.broadcast %cst_29 : f32 to vector<8x128xf32>
    %39 = arith.maximumf %37, %38 : vector<8x128xf32>
    %cst_30 = arith.constant 5.000000e-01 : f32
    %40 = vector.broadcast %cst_30 : f32 to vector<8x128xf32>
    %41 = arith.mulf %40, %39 : vector<8x128xf32>
    %c12 = arith.constant 12 : index
    %c0_31 = arith.constant 0 : index
    %c0_32 = arith.constant 0 : index
    %42 = vector.load %arg1[%c12, %c0_31, %c0_32] : memref<15x8x128xf32, #tpu.memory_space<vmem>>, vector<1x8x128xf32>
    %43 = vector.shape_cast %42 : vector<1x8x128xf32> to vector<8x128xf32>
    %cst_33 = arith.constant 0.000000e+00 : f32
    %44 = vector.broadcast %cst_33 : f32 to vector<8x128xf32>
    %45 = arith.maximumf %43, %44 : vector<8x128xf32>
    %cst_34 = arith.constant 5.000000e-01 : f32
    %46 = vector.broadcast %cst_34 : f32 to vector<8x128xf32>
    %47 = arith.mulf %46, %45 : vector<8x128xf32>
    %c14 = arith.constant 14 : index
    %c0_35 = arith.constant 0 : index
    %c0_36 = arith.constant 0 : index
    %48 = vector.load %arg1[%c14, %c0_35, %c0_36] : memref<15x8x128xf32, #tpu.memory_space<vmem>>, vector<1x8x128xf32>
    %49 = vector.shape_cast %48 : vector<1x8x128xf32> to vector<8x128xf32>
    %50 = arith.subf %1, %11 : vector<8x128xf32>
    %51 = arith.subf %25, %35 : vector<8x128xf32>
    %52 = arith.maximumf %50, %51 : vector<8x128xf32>
    %53 = arith.addf %1, %11 : vector<8x128xf32>
    %54 = arith.addf %25, %35 : vector<8x128xf32>
    %55 = arith.minimumf %53, %54 : vector<8x128xf32>
    %56 = arith.subf %55, %52 : vector<8x128xf32>
    %cst_37 = arith.constant 0.000000e+00 : f32
    %57 = vector.broadcast %cst_37 : f32 to vector<8x128xf32>
    %58 = arith.maximumf %56, %57 : vector<8x128xf32>
    %59 = arith.subf %3, %17 : vector<8x128xf32>
    %60 = arith.subf %27, %41 : vector<8x128xf32>
    %61 = arith.maximumf %59, %60 : vector<8x128xf32>
    %62 = arith.addf %3, %17 : vector<8x128xf32>
    %63 = arith.addf %27, %41 : vector<8x128xf32>
    %64 = arith.minimumf %62, %63 : vector<8x128xf32>
    %65 = arith.subf %64, %61 : vector<8x128xf32>
    %cst_38 = arith.constant 0.000000e+00 : f32
    %66 = vector.broadcast %cst_38 : f32 to vector<8x128xf32>
    %67 = arith.maximumf %65, %66 : vector<8x128xf32>
    %68 = arith.mulf %58, %67 : vector<8x128xf32>
    %69 = arith.subf %5, %23 : vector<8x128xf32>
    %70 = arith.subf %29, %47 : vector<8x128xf32>
    %71 = arith.maximumf %69, %70 : vector<8x128xf32>
    %72 = arith.addf %5, %23 : vector<8x128xf32>
    %73 = arith.addf %29, %47 : vector<8x128xf32>
    %74 = arith.minimumf %72, %73 : vector<8x128xf32>
    %75 = arith.subf %74, %71 : vector<8x128xf32>
    %cst_39 = arith.constant 0.000000e+00 : f32
    %76 = vector.broadcast %cst_39 : f32 to vector<8x128xf32>
    %77 = arith.maximumf %75, %76 : vector<8x128xf32>
    %78 = arith.mulf %68, %77 : vector<8x128xf32>
    %79 = arith.mulf %11, %17 : vector<8x128xf32>
    %80 = arith.mulf %79, %23 : vector<8x128xf32>
    %cst_40 = arith.constant 8.000000e+00 : f32
    %81 = vector.broadcast %cst_40 : f32 to vector<8x128xf32>
    %82 = arith.mulf %81, %80 : vector<8x128xf32>
    %83 = arith.mulf %35, %41 : vector<8x128xf32>
    %84 = arith.mulf %83, %47 : vector<8x128xf32>
    %cst_41 = arith.constant 8.000000e+00 : f32
    %85 = vector.broadcast %cst_41 : f32 to vector<8x128xf32>
    %86 = arith.mulf %85, %84 : vector<8x128xf32>
    %87 = arith.addf %82, %86 : vector<8x128xf32>
    %88 = arith.subf %87, %78 : vector<8x128xf32>
    %cst_42 = arith.constant 1.000000e-07 : f32
    %89 = vector.broadcast %cst_42 : f32 to vector<8x128xf32>
    %90 = arith.maximumf %88, %89 : vector<8x128xf32>
    %91 = tpu.reciprocal %90 {approx = true} : vector<8x128xf32> -> vector<8x128xf32>
    %92 = arith.mulf %78, %91 : vector<8x128xf32>
    %cst_43 = arith.constant 1.000000e+00 : f32
    %93 = vector.broadcast %cst_43 : f32 to vector<8x128xf32>
    %94 = arith.subf %93, %92 : vector<8x128xf32>
    %95 = arith.mulf %94, %49 : vector<8x128xf32>
    %96 = vector.shape_cast %95 : vector<8x128xf32> to vector<1x8x128xf32>
    %cst_44 = arith.constant dense<0.000000e+00> : vector<8x128xf32>
    %97 = vector.multi_reduction <add>, %96, %cst_44 [0] : vector<1x8x128xf32> to vector<8x128xf32>
    %98 = vector.shape_cast %97 : vector<8x128xf32> to vector<1x8x128xf32>
    %c0_45 = arith.constant 0 : index
    %c0_46 = arith.constant 0 : index
    %c0_47 = arith.constant 0 : index
    %99 = vector.load %arg2[%c0_45, %c0_46, %c0_47] : memref<1x8x128xf32, #tpu.memory_space<vmem>>, vector<1x8x128xf32>
    tpu.vector_store %arg2[%c0_45, %c0_46, %c0_47], %98 {strides = array<i32>} : memref<1x8x128xf32, #tpu.memory_space<vmem>>, vector<1x8x128xf32>,
    return
  }
  func.func @transform_0(%arg0: i32) -> (i32, i32, i32) {
    %c0_i32 = arith.constant 0 : i32
    %c0_i32_0 = arith.constant 0 : i32
    %c0_i32_1 = arith.constant 0 : i32
    return %c0_i32, %arg0, %c0_i32_0 : i32, i32, i32
  }
  func.func @transform_1(%arg0: i32) -> (i32, i32, i32) {
    %c0_i32 = arith.constant 0 : i32
    %c0_i32_0 = arith.constant 0 : i32
    %c0_i32_1 = arith.constant 0 : i32
    return %arg0, %c0_i32, %c0_i32_0 : i32, i32, i32
  }
}

</mosaic_0001>

<bundles_post_ra>
// kernel: _iou3d_pallas_sum.1
= control target key start
LH: loop header
LB: loop body
LE: loop exit
PB: predicated region body
PF: predicated region fallthrough
CT: control target
= control target key end

     0   :  { %6 = vsyncpa [#allocation3], 0  ;;  %s535_s0 = inlined_call_operand.hbm [shape: f32[15,16,128], index: 0, kind: input, shape index: {}]   ;;  %s536_s1 = inlined_call_operand.vmem [shape: f32[2,8,128], index: 1, kind: output, shape index: {}]  }
   0x1   :  { %8 = vsyncpa [#allocation3 + $0x1], 0  ;;  %s421_s6 = smov 0   ;;  %s423_s7 = smov 0  }
   0x2   :  { %s425_s8 = smov 0   ;;  %s427_s9 = smov 0  }
   0x3 LB: > { %s440_s10 = sadd.s32 4294967295, %s405_s9   ;;  %s443_s11 = sadd.s32 1, %s405_s9   ;;  %s405_s9 = sphi %s427_s9, %s544_s9   ;;  %s401_s8 = sphi %s425_s8, %s543_s8   ;;  %s397_s7 = sphi %s423_s7, %s542_s7   ;;  %s393_s6 = sphi %s421_s6, %s541_s6  }
   0x4   : > { %s18_s12 = ssub.s32 %s405_s9, %s443_s11  ;;  %s21_s13 = sadd.s32 1, %s401_s8 }
   0x5   : > { %p19_p0 = scmp.eq.s32.totalorder %s18_s12, 0  ;;  %p28_p1 = scmp.ne.s32.totalorder %s401_s8, %s397_s7 }
   0x6   : > { %p29_p2 = scmp.eq.s32.totalorder %s405_s9, 0  ;;  %p34_p3 = scmp.ne.s32.totalorder %s397_s7, %s393_s6 }
   0x7   : > { %s453_s14 = scalar_select %p19_p0, %s401_s8, %s21_s13  }
   0x8   : > { %p30_p4 = por %p29_p2, %p28_p1  ;;  %p35_p5 = scmp.eq.s32.totalorder %s440_s10, 0 }
   0x9   : > { %p305_p6 = scmp.lt.s32.totalorder %s405_s9, 2  ;;  %s84_s16 = sand.u32 1, %s401_s8  }
   0xa   : > { %p457_p7 = por %p35_p5, %p34_p3  ;;  %s297_s17 = smul.u32 120, %s84_s16 }
   0xb   : > { %s280_s18 = sshll.u32 %s405_s9, 7  ;;  %p463_p8 = pnand %p305_p6, %p30_p4 }
   0xc   : > { %s538_s15 = scalar_select %p457_p7, 1, 0 }
   0xd   : > { %s470_s22 = scalar_lea.hbm %s535_s0, %s280_s18  ;;  %s88_s23 = scalar_lea.vmem [#allocation2], %s297_s17 }
   0xe   : > { %s94_s24 = sshll.u32 %s88_s23, 4  ;;  %s474_s25 = scalar_lea.sflag [#allocation3], %s84_s16  ;;  %s472_s24 = int_to_ptr.vmem [resolvable:$true] %s94_s24 }
   0xf   : > { %s343_s26 = scalar_lea.hbm %s470_s22, 1920  ;;  %p345_p10 = pneg %p463_p8 }
  0x10   : > { %p344_p9 = scmp.ne.s32.totalorder %s470_s22, %s343_s26  ;;  %s348_s29 = scalar_lea.hbm %s535_s0, 3840 }
  0x11   : > { %p349_p13 = scmp.lt.s32.totalorder %s470_s22, %s535_s0  ;;  %p350_p0 = scmp.lt.s32.totalorder %s348_s29, %s343_s26 }
  0x12   : > { %p346_p11 = pnand %p345_p10, %p344_p9 }
  0x13   : > { %p351_p1 = por %p350_p0, %p349_p13 }
  0x14   : > { %p347_p12 = pneg %p346_p11 }
  0x16   : > { %p352_p2 = pnand %p351_p1, %p347_p12 }
  0x18   : > { %355 = shalt.err (!%p352_p2)
}
  0x19   : > { %s356_s3 = scalar_lea.vmem %s472_s24, 1920  ;;  %s407_s4 = smov [#allocation2]  }
  0x1a   : > { %p357_p3 = scmp.ne.s32.totalorder %s472_s24, %s356_s3  ;;  %s361_s5 = sshll.u32 %s407_s4, 4  ;;  %s362_s5 = int_to_ptr.vmem [resolvable:$false] %s361_s5 }
  0x1b   : > { %s363_s6 = scalar_lea.vmem %s362_s5, 3840  ;;  %p364_p6 = scmp.lt.s32.totalorder %s472_s24, %s362_s5 }
  0x1c   : > { %p359_p4 = pnand %p357_p3, %p345_p10  ;;  %p365_p9 = scmp.lt.s32.totalorder %s363_s6, %s356_s3 }
  0x1e   : > { %p360_p5 = pneg %p359_p4  ;;  %p366_p11 = por %p365_p9, %p364_p6 }
  0x20   : > { %p367_p7 = pnand %p366_p11, %p360_p5 }
  0x22   : > { %370 = shalt.err (!%p367_p7)
}
  0x23   : > { %s408_s12 = smov 256   ;;  %s409_s13 = smov 128  }
  0x24   : > { %s410_s16 = smov 8   ;;  %p281_p10 = scmp.ge.s32.totalorder %s405_s9, 1 }
  0x25   : > { %304 = dma.hbm_to_vmem [thread:$0]  (!%p463_p8), %s470_s22, 1920, %s472_s24, %s474_s25, %s408_s12, %s409_s13, %s410_s16  }
  0x26   : > { %p102_p12 = scmp.lt.s32.totalorder %s405_s9, 3 }
  0x28   : > { %p103_p13 = pnand %p281_p10, %p102_p12 }
  0x29   : > { %s108_s17 = sand.u32 (!%p103_p13), 1, %s397_s7   ;;  %p540_p7 = scmp.ne.s32.totalorder (!%p103_p13), %s538_s15, 0 }
  0x2a   : > { %106 = sbr.rel (%p103_p13) target bundleno = 93 (0x5d), region = 24  ;;  %s109_s20 = scalar_lea.sflag (!%p103_p13), [#allocation3], %s108_s17 }
  0x2b   : > { %s298_s18 = smul.u32 (!%p103_p13), 120, %s108_s17 }
  0x2d   : > { %s498_s21 = scalar_lea.vmem (!%p103_p13), [#allocation2], %s298_s18 }
  0x2f   : > { %388 = dma.done.wait (%p540_p7), %s109_s20, 1920  }
  0x30   : > { %390 = vsyncadd (%p540_p7), %s109_s20, 4294965376  ;;  %v285_v0 = vld [vmem:[%s498_s21 + $0x18] sm:$0xff]  ;;  %v286_v1 = vld [vmem:[%s498_s21 + $0x20] sm:$0xff]  ;;  %p130_p8 = scmp.lt.s32.totalorder %s440_s10, 1 }
  0x31   : > { %v287_v2 = vld [vmem:[%s498_s21 + $0x28] sm:$0xff]  ;;  %v134_v3 = vld [vmem:[%s498_s21] sm:$0xff]  ;;  %v141_v5 = vmax.f32 %v285_v0, 0.0  ;;  %v145_v6 = vmax.f32 %v286_v1, 0.0  ;;  %v291_v8 = vld [vmem:[%s498_s21 + $0x50] sm:$0xff] }
  0x32   : > { %v283_v4 = vld [vmem:[%s498_s21 + $0x8] sm:$0xff]  ;;  %v149_v7 = vmax.f32 %v287_v2, 0.0  ;;  %v292_v9 = vld [vmem:[%s498_s21 + $0x58] sm:$0xff]  ;;  %v293_v10 = vld [vmem:[%s498_s21 + $0x60] sm:$0xff]  ;;  %v159_v15 = vmax.f32 %v291_v8, 0.0  ;;  %s546_s10 = smov (!%p130_p8, %s440_s10), 1 }
  0x33   : > { %v284_v11 = vld [vmem:[%s498_s21 + $0x10] sm:$0xff]  ;;  %v142_v12 = vmul.f32 0.5, %v141_v5  ;;  %v146_v13 = vmul.f32 0.5, %v145_v6  ;;  %v288_v16 = vld [vmem:[%s498_s21 + $0x38] sm:$0xff]  ;;  %v163_v17 = vmax.f32 %v292_v9, 0.0  ;;  %v167_v18 = vmax.f32 %v293_v10, 0.0 }
  0x34   : > { %v150_v14 = vmul.f32 0.5, %v149_v7  ;;  %v289_v19 = vld [vmem:[%s498_s21 + $0x40] sm:$0xff]  ;;  %v290_v20 = vld [vmem:[%s498_s21 + $0x48] sm:$0xff]  ;;  %v160_v21 = vmul.f32 0.5, %v159_v15  ;;  %s282_s9 = sshll.u32 %s546_s10, 3  ;;  %v294_v61 = vld [vmem:[%s498_s21 + $0x70] sm:$0xff] }
  0x35   : > { %v171_v22 = vsub.f32 %v134_v3, %v142_v12  ;;  %v174_v23 = vadd.f32 %v142_v12, %v134_v3  ;;  %v179_v24 = vsub.f32 %v283_v4, %v146_v13  ;;  %v164_v25 = vmul.f32 0.5, %v163_v17  ;;  %s133_s22 = scalar_lea.vmem %s536_s1, %s282_s9 }
  0x36   : > { %v168_v26 = vmul.f32 0.5, %v167_v18  ;;  %v182_v27 = vadd.f32 %v283_v4, %v146_v13  ;;  %v188_v28 = vsub.f32 %v284_v11, %v150_v14  ;;  %v172_v29 = vsub.f32 %v288_v16, %v160_v21 }
  0x37   : > { %v175_v30 = vadd.f32 %v288_v16, %v160_v21  ;;  %v191_v31 = vadd.f32 %v284_v11, %v150_v14  ;;  %v197_v32 = vmul.f32 %v146_v13, %v142_v12  ;;  %v180_v33 = vsub.f32 %v289_v19, %v164_v25 }
  0x38   : > { %v183_v34 = vadd.f32 %v289_v19, %v164_v25  ;;  %v189_v35 = vsub.f32 %v290_v20, %v168_v26  ;;  %v192_v36 = vadd.f32 %v290_v20, %v168_v26  ;;  %v173_v37 = vmax.f32 %v171_v22, %v172_v29 }
  0x39   : > { %v176_v38 = vmin.f32 %v174_v23, %v175_v30  ;;  %v198_v39 = vmul.f32 %v197_v32, %v150_v14  ;;  %v200_v40 = vmul.f32 %v164_v25, %v160_v21  ;;  %v181_v41 = vmax.f32 %v179_v24, %v180_v33 }
  0x3a   : > { %v184_v42 = vmin.f32 %v182_v27, %v183_v34  ;;  %v190_v43 = vmax.f32 %v188_v28, %v189_v35  ;;  %v193_v44 = vmin.f32 %v191_v31, %v192_v36 }
  0x3b   : > { %v177_v45 = vsub.f32 %v176_v38, %v173_v37  ;;  %v201_v46 = vmul.f32 %v200_v40, %v168_v26  ;;  %v199_v49 = vmul.f32 8.0, %v198_v39 }
  0x3c   : > { %v185_v47 = vsub.f32 %v184_v42, %v181_v41  ;;  %v194_v48 = vsub.f32 %v193_v44, %v190_v43 }
  0x3d   : > { %v178_v50 = vmax.f32 %v177_v45, 0.0  ;;  %v202_v51 = vmul.f32 8.0, %v201_v46 }
  0x3e   : > { %v186_v52 = vmax.f32 %v185_v47, 0.0  ;;  %v195_v53 = vmax.f32 %v194_v48, 0.0 }
  0x3f   : > { %v203_v55 = vadd.f32 %v202_v51, %v199_v49 }
  0x40   : > { %v187_v54 = vmul.f32 %v186_v52, %v178_v50 }
  0x42   : > { %v196_v56 = vmul.f32 %v195_v53, %v187_v54 }
  0x44   : > { %v204_v57 = vsub.f32 %v203_v55, %v196_v56 }
  0x46   : > { %v205_v58 = vmax.f32 %v204_v57, 1e-07 }
  0x48   : > { %341 = vrcp.f32 %v205_v58 }
  0x55   : > { %v342_v59 = vpop.eup %341 }
  0x56   : > { %v207_v60 = vmul.f32 %v342_v59, %v196_v56 }
  0x58   : > { %v208_v62 = vsub.f32 1.0, %v207_v60 }
  0x5a   : > { %v209_v63 = vmul.f32 %v294_v61, %v208_v62 }
  0x5c   : > { %211 = vst [vmem:[%s133_s22] sm:$0xff] %v209_v63 }
  0x5d PF: > { %p11_p0 = scmp.ge.s32.totalorder %s443_s11, 4   ;;  %s541_s6 = smov %s397_s7 }
  0x5e   : > { %s542_s7 = smov %s401_s8  ;;  %s543_s8 = smov %s453_s14 }
  0x5f   : > { %s544_s9 = smov %s443_s11  ;;  %13 = sbr.rel (!%p11_p0) target bundleno = 3 (0x3), region = 76 }
  0x64   :  { %231 = vsyncpa [#allocation3], 1 }
  0x65   :  { %233 = vsyncpa [#allocation3 + $0x1], 1 }

</bundles_post_ra>
